<compile_context>
chip_gen: v5e
topology: v5e:2x2
jax: 0.10.0
libtpu: 0.0.40
codegen_flags: <defaults>
</compile_context>

<pallas_src>
import jax
import jax.numpy as jnp
from jax.experimental import pallas as pl
from jax.experimental.pallas import tpu as pltpu

K = 3                 # kernel size
CIN = 3               # input channels (== groups)
CPG = 2               # output channels per group
COUT = CIN * CPG      # 6
EPS = 1e-5


def _convt_bn_relu_kernel(taps_ref, w_ref, b_ref, g_ref, be_ref, o_ref):
    """Fused grouped ConvTranspose2d + BatchNorm2d(train) + ReLU, lane-dense.

    taps_ref : (K*K, COUT, M) f32 VMEM -- im2col tap windows; row co of tap t is
                                          the t-th shifted window of input
                                          channel co // CPG, flattened over
                                          (N, Ho, Wo) with M = N*Ho*Wo.
    w_ref    : (K*K, COUT, 1) f32 VMEM -- spatially flipped weights per (tap, out-ch)
    b_ref    : (COUT, 1)      f32 VMEM -- conv bias
    g_ref    : (COUT, 1)      f32 VMEM -- BN gamma
    be_ref   : (COUT, 1)      f32 VMEM -- BN beta
    o_ref    : (COUT, M)      f32 VMEM -- output (channel-major, flattened spatial)
    """
    # Transposed conv == correlation of the padded input with the spatially
    # flipped kernel; here each tap is already a precomputed (COUT, M) slab,
    # so the contraction is 9 broadcasted multiply-adds on the VPU.
    acc = b_ref[...] + taps_ref[0] * w_ref[0]          # (COUT, M)
    for t in range(1, K * K):
        acc = acc + taps_ref[t] * w_ref[t]

    # BatchNorm (training mode): per-channel batch stats over (N, H, W), which
    # is exactly the lane (M) axis here.  Two-pass centered variance (biased).
    mean = jnp.mean(acc, axis=-1, keepdims=True)        # (COUT, 1)
    cen = acc - mean
    var = jnp.mean(cen * cen, axis=-1, keepdims=True)   # (COUT, 1)
    scale = g_ref[...] * jax.lax.rsqrt(var + EPS)       # (COUT, 1)

    # BN affine + ReLU, one wide store.
    o_ref[...] = jnp.maximum(cen * scale + be_ref[...], 0.0).astype(o_ref.dtype)


def conv_transpose_net(x, weight, bias, gamma, beta):
    """Forward pass of ConvTransposeNet.

    x      : (N, 3, H, W) f32
    weight : (3, 2, 3, 3) f32 -- PyTorch ConvTranspose2d layout (Cin, Cout/groups, kH, kW)
    bias   : (6,) f32
    gamma, beta : (6,) f32    -- BatchNorm2d affine parameters
    returns (N, 6, H+2, W+2) f32
    """
    n, cin, h, w = x.shape
    assert cin == CIN
    ho, wo = h + K - 1, w + K - 1
    m = n * ho * wo

    # ---- Wrapper-side layout plumbing (tiny, XLA-fused) -------------------
    # Zero-pad by K-1 per spatial side; build the 9 shifted tap windows
    # (im2col) and flatten (N, Ho, Wo) into one lane-dense axis of length M.
    xp = jnp.pad(x, ((0, 0), (0, 0), (K - 1, K - 1), (K - 1, K - 1)))
    taps = jnp.stack(
        [xp[:, :, kh:kh + ho, kw:kw + wo]            # (N, CIN, Ho, Wo)
         for kh in range(K) for kw in range(K)],
        axis=0,
    )                                                # (K*K, N, CIN, Ho, Wo)
    taps = taps.transpose(0, 2, 1, 3, 4).reshape(K * K, CIN, m)
    # Replicate each input channel's taps for both outputs of its group so the
    # kernel's accumulation is a single dense (COUT, M) multiply-add per tap.
    taps = jnp.repeat(taps, CPG, axis=1).astype(jnp.float32)   # (K*K, COUT, M)

    # Spatially flipped weights, laid out (tap, out-channel, 1) for lane
    # broadcast inside the kernel; co = ci*CPG + j, t = kh*K + kw.
    w_flip = weight[:, :, ::-1, ::-1].astype(jnp.float32)      # (CIN, CPG, K, K)
    w_prep = w_flip.reshape(COUT, K * K).T.reshape(K * K, COUT, 1)

    out = pl.pallas_call(
        _convt_bn_relu_kernel,
        out_shape=jax.ShapeDtypeStruct((COUT, m), jnp.float32),
        in_specs=[
            pl.BlockSpec(memory_space=pltpu.MemorySpace.VMEM),   # taps
            pl.BlockSpec(memory_space=pltpu.MemorySpace.VMEM),   # weights
            pl.BlockSpec(memory_space=pltpu.MemorySpace.VMEM),   # bias
            pl.BlockSpec(memory_space=pltpu.MemorySpace.VMEM),   # gamma
            pl.BlockSpec(memory_space=pltpu.MemorySpace.VMEM),   # beta
        ],
        out_specs=pl.BlockSpec(memory_space=pltpu.MemorySpace.VMEM),
    )(
        taps,
        w_prep,
        bias.reshape(COUT, 1).astype(jnp.float32),
        gamma.reshape(COUT, 1).astype(jnp.float32),
        beta.reshape(COUT, 1).astype(jnp.float32),
    )

    # Back to NCHW (wrapper-side relayout, XLA-fused).
    return out.reshape(COUT, n, ho, wo).transpose(1, 0, 2, 3)


def _reference(x, weight, bias, gamma, beta):
    """Pure-JAX reference: direct per-channel translation of the torch module
    (ConvTranspose2d with bias -> BatchNorm2d training-mode -> ReLU)."""
    n, _, h, w = x.shape
    ho, wo = h + K - 1, w + K - 1
    xp = jnp.pad(x, ((0, 0), (0, 0), (K - 1, K - 1), (K - 1, K - 1)))
    outs = []
    for co in range(COUT):
        ci = co // CPG
        wf = weight[ci, co % CPG, ::-1, ::-1]
        acc = jnp.zeros((n, ho, wo), jnp.float32)
        for kh in range(K):
            for kw in range(K):
                acc = acc + xp[:, ci, kh:kh + ho, kw:kw + wo] * wf[kh, kw]
        acc = acc + bias[co]
        mean = jnp.mean(acc)
        var = jnp.mean((acc - mean) ** 2)
        y = (acc - mean) * jax.lax.rsqrt(var + EPS) * gamma[co] + beta[co]
        outs.append(jnp.maximum(y, 0.0))
    return jnp.stack(outs, axis=1)


if __name__ == "__main__":
    key = jax.random.PRNGKey(0)
    k_w, k_b, k_g, k_be, k_x = jax.random.split(key, 5)

    # Deterministic synthetic parameters (shapes match the torch module):
    # ConvTranspose2d(3, 6, 3, groups=3): weight (3, 2, 3, 3), bias (6,)
    weight = 0.1 * jax.random.normal(k_w, (CIN, CPG, K, K), jnp.float32)
    bias = 0.1 * jax.random.normal(k_b, (COUT,), jnp.float32)
    # BatchNorm2d(6) affine params
    gamma = 1.0 + 0.1 * jax.random.normal(k_g, (COUT,), jnp.float32)
    beta = 0.1 * jax.random.normal(k_be, (COUT,), jnp.float32)

    # Small NCHW input consistent with the module: (2, 3, 16, 16)
    x = jax.random.normal(k_x, (2, CIN, 16, 16), jnp.float32)

    out = conv_transpose_net(x, weight, bias, gamma, beta)
    out = jax.block_until_ready(out)
    assert out.shape == (2, COUT, 18, 18), out.shape
    assert out.dtype == jnp.float32

    # Correctness check against the pure-JAX reference.
    ref = _reference(x, weight, bias, gamma, beta)
    max_err = float(jnp.max(jnp.abs(out - ref)))
    assert bool(jnp.allclose(out, ref, rtol=2e-3, atol=2e-3)), max_err

    print("KERNEL_OK")
</pallas_src>

<mosaic_0001>
module attributes {stable_mosaic.version = 11 : i64} {
  func.func @_convt_bn_relu_kernel(%arg0: memref<9x6x648xf32, #tpu.memory_space<vmem>>, %arg1: memref<9x6x1xf32, #tpu.memory_space<vmem>>, %arg2: memref<6x1xf32, #tpu.memory_space<vmem>>, %arg3: memref<6x1xf32, #tpu.memory_space<vmem>>, %arg4: memref<6x1xf32, #tpu.memory_space<vmem>>, %arg5: memref<6x648xf32, #tpu.memory_space<vmem>>) attributes {dimension_semantics = [], scalar_prefetch = 0 : i64, scratch_operands = 0 : i64, tpu.core_type = #tpu.core_type<tc>} {
    %c0 = arith.constant 0 : index
    %c0_0 = arith.constant 0 : index
    %0 = vector.load %arg2[%c0, %c0_0] : memref<6x1xf32, #tpu.memory_space<vmem>>, vector<6x1xf32>
    %c0_1 = arith.constant 0 : index
    %c0_2 = arith.constant 0 : index
    %c0_3 = arith.constant 0 : index
    %1 = vector.load %arg0[%c0_1, %c0_2, %c0_3] : memref<9x6x648xf32, #tpu.memory_space<vmem>>, vector<1x6x648xf32>
    %2 = vector.shape_cast %1 : vector<1x6x648xf32> to vector<6x648xf32>
    %c0_4 = arith.constant 0 : index
    %c0_5 = arith.constant 0 : index
    %c0_6 = arith.constant 0 : index
    %3 = vector.load %arg1[%c0_4, %c0_5, %c0_6] : memref<9x6x1xf32, #tpu.memory_space<vmem>>, vector<1x6x1xf32>
    %4 = vector.shape_cast %3 : vector<1x6x1xf32> to vector<6x1xf32>
    %5 = vector.broadcast %4 : vector<6x1xf32> to vector<6x648xf32>
    %6 = arith.mulf %2, %5 : vector<6x648xf32>
    %7 = vector.broadcast %0 : vector<6x1xf32> to vector<6x648xf32>
    %8 = arith.addf %7, %6 : vector<6x648xf32>
    %c1 = arith.constant 1 : index
    %c0_7 = arith.constant 0 : index
    %c0_8 = arith.constant 0 : index
    %9 = vector.load %arg0[%c1, %c0_7, %c0_8] : memref<9x6x648xf32, #tpu.memory_space<vmem>>, vector<1x6x648xf32>
    %10 = vector.shape_cast %9 : vector<1x6x648xf32> to vector<6x648xf32>
    %c1_9 = arith.constant 1 : index
    %c0_10 = arith.constant 0 : index
    %c0_11 = arith.constant 0 : index
    %11 = vector.load %arg1[%c1_9, %c0_10, %c0_11] : memref<9x6x1xf32, #tpu.memory_space<vmem>>, vector<1x6x1xf32>
    %12 = vector.shape_cast %11 : vector<1x6x1xf32> to vector<6x1xf32>
    %13 = vector.broadcast %12 : vector<6x1xf32> to vector<6x648xf32>
    %14 = arith.mulf %10, %13 : vector<6x648xf32>
    %15 = arith.addf %8, %14 : vector<6x648xf32>
    %c2 = arith.constant 2 : index
    %c0_12 = arith.constant 0 : index
    %c0_13 = arith.constant 0 : index
    %16 = vector.load %arg0[%c2, %c0_12, %c0_13] : memref<9x6x648xf32, #tpu.memory_space<vmem>>, vector<1x6x648xf32>
    %17 = vector.shape_cast %16 : vector<1x6x648xf32> to vector<6x648xf32>
    %c2_14 = arith.constant 2 : index
    %c0_15 = arith.constant 0 : index
    %c0_16 = arith.constant 0 : index
    %18 = vector.load %arg1[%c2_14, %c0_15, %c0_16] : memref<9x6x1xf32, #tpu.memory_space<vmem>>, vector<1x6x1xf32>
    %19 = vector.shape_cast %18 : vector<1x6x1xf32> to vector<6x1xf32>
    %20 = vector.broadcast %19 : vector<6x1xf32> to vector<6x648xf32>
    %21 = arith.mulf %17, %20 : vector<6x648xf32>
    %22 = arith.addf %15, %21 : vector<6x648xf32>
    %c3 = arith.constant 3 : index
    %c0_17 = arith.constant 0 : index
    %c0_18 = arith.constant 0 : index
    %23 = vector.load %arg0[%c3, %c0_17, %c0_18] : memref<9x6x648xf32, #tpu.memory_space<vmem>>, vector<1x6x648xf32>
    %24 = vector.shape_cast %23 : vector<1x6x648xf32> to vector<6x648xf32>
    %c3_19 = arith.constant 3 : index
    %c0_20 = arith.constant 0 : index
    %c0_21 = arith.constant 0 : index
    %25 = vector.load %arg1[%c3_19, %c0_20, %c0_21] : memref<9x6x1xf32, #tpu.memory_space<vmem>>, vector<1x6x1xf32>
    %26 = vector.shape_cast %25 : vector<1x6x1xf32> to vector<6x1xf32>
    %27 = vector.broadcast %26 : vector<6x1xf32> to vector<6x648xf32>
    %28 = arith.mulf %24, %27 : vector<6x648xf32>
    %29 = arith.addf %22, %28 : vector<6x648xf32>
    %c4 = arith.constant 4 : index
    %c0_22 = arith.constant 0 : index
    %c0_23 = arith.constant 0 : index
    %30 = vector.load %arg0[%c4, %c0_22, %c0_23] : memref<9x6x648xf32, #tpu.memory_space<vmem>>, vector<1x6x648xf32>
    %31 = vector.shape_cast %30 : vector<1x6x648xf32> to vector<6x648xf32>
    %c4_24 = arith.constant 4 : index
    %c0_25 = arith.constant 0 : index
    %c0_26 = arith.constant 0 : index
    %32 = vector.load %arg1[%c4_24, %c0_25, %c0_26] : memref<9x6x1xf32, #tpu.memory_space<vmem>>, vector<1x6x1xf32>
    %33 = vector.shape_cast %32 : vector<1x6x1xf32> to vector<6x1xf32>
    %34 = vector.broadcast %33 : vector<6x1xf32> to vector<6x648xf32>
    %35 = arith.mulf %31, %34 : vector<6x648xf32>
    %36 = arith.addf %29, %35 : vector<6x648xf32>
    %c5 = arith.constant 5 : index
    %c0_27 = arith.constant 0 : index
    %c0_28 = arith.constant 0 : index
    %37 = vector.load %arg0[%c5, %c0_27, %c0_28] : memref<9x6x648xf32, #tpu.memory_space<vmem>>, vector<1x6x648xf32>
    %38 = vector.shape_cast %37 : vector<1x6x648xf32> to vector<6x648xf32>
    %c5_29 = arith.constant 5 : index
    %c0_30 = arith.constant 0 : index
    %c0_31 = arith.constant 0 : index
    %39 = vector.load %arg1[%c5_29, %c0_30, %c0_31] : memref<9x6x1xf32, #tpu.memory_space<vmem>>, vector<1x6x1xf32>
    %40 = vector.shape_cast %39 : vector<1x6x1xf32> to vector<6x1xf32>
    %41 = vector.broadcast %40 : vector<6x1xf32> to vector<6x648xf32>
    %42 = arith.mulf %38, %41 : vector<6x648xf32>
    %43 = arith.addf %36, %42 : vector<6x648xf32>
    %c6 = arith.constant 6 : index
    %c0_32 = arith.constant 0 : index
    %c0_33 = arith.constant 0 : index
    %44 = vector.load %arg0[%c6, %c0_32, %c0_33] : memref<9x6x648xf32, #tpu.memory_space<vmem>>, vector<1x6x648xf32>
    %45 = vector.shape_cast %44 : vector<1x6x648xf32> to vector<6x648xf32>
    %c6_34 = arith.constant 6 : index
    %c0_35 = arith.constant 0 : index
    %c0_36 = arith.constant 0 : index
    %46 = vector.load %arg1[%c6_34, %c0_35, %c0_36] : memref<9x6x1xf32, #tpu.memory_space<vmem>>, vector<1x6x1xf32>
    %47 = vector.shape_cast %46 : vector<1x6x1xf32> to vector<6x1xf32>
    %48 = vector.broadcast %47 : vector<6x1xf32> to vector<6x648xf32>
    %49 = arith.mulf %45, %48 : vector<6x648xf32>
    %50 = arith.addf %43, %49 : vector<6x648xf32>
    %c7 = arith.constant 7 : index
    %c0_37 = arith.constant 0 : index
    %c0_38 = arith.constant 0 : index
    %51 = vector.load %arg0[%c7, %c0_37, %c0_38] : memref<9x6x648xf32, #tpu.memory_space<vmem>>, vector<1x6x648xf32>
    %52 = vector.shape_cast %51 : vector<1x6x648xf32> to vector<6x648xf32>
    %c7_39 = arith.constant 7 : index
    %c0_40 = arith.constant 0 : index
    %c0_41 = arith.constant 0 : index
    %53 = vector.load %arg1[%c7_39, %c0_40, %c0_41] : memref<9x6x1xf32, #tpu.memory_space<vmem>>, vector<1x6x1xf32>
    %54 = vector.shape_cast %53 : vector<1x6x1xf32> to vector<6x1xf32>
    %55 = vector.broadcast %54 : vector<6x1xf32> to vector<6x648xf32>
    %56 = arith.mulf %52, %55 : vector<6x648xf32>
    %57 = arith.addf %50, %56 : vector<6x648xf32>
    %c8 = arith.constant 8 : index
    %c0_42 = arith.constant 0 : index
    %c0_43 = arith.constant 0 : index
    %58 = vector.load %arg0[%c8, %c0_42, %c0_43] : memref<9x6x648xf32, #tpu.memory_space<vmem>>, vector<1x6x648xf32>
    %59 = vector.shape_cast %58 : vector<1x6x648xf32> to vector<6x648xf32>
    %c8_44 = arith.constant 8 : index
    %c0_45 = arith.constant 0 : index
    %c0_46 = arith.constant 0 : index
    %60 = vector.load %arg1[%c8_44, %c0_45, %c0_46] : memref<9x6x1xf32, #tpu.memory_space<vmem>>, vector<1x6x1xf32>
    %61 = vector.shape_cast %60 : vector<1x6x1xf32> to vector<6x1xf32>
    %62 = vector.broadcast %61 : vector<6x1xf32> to vector<6x648xf32>
    %63 = arith.mulf %59, %62 : vector<6x648xf32>
    %64 = arith.addf %57, %63 : vector<6x648xf32>
    %cst = arith.constant dense<0.000000e+00> : vector<6xf32>
    %65 = vector.multi_reduction <add>, %64, %cst [1] : vector<6x648xf32> to vector<6xf32>
    %66 = vector.shape_cast %65 : vector<6xf32> to vector<6x1xf32>
    %cst_47 = arith.constant 6.480000e+02 : f32
    %67 = vector.broadcast %cst_47 : f32 to vector<6x1xf32>
    %68 = arith.divf %66, %67 : vector<6x1xf32>
    %69 = vector.broadcast %68 : vector<6x1xf32> to vector<6x648xf32>
    %70 = arith.subf %64, %69 : vector<6x648xf32>
    %71 = arith.mulf %70, %70 : vector<6x648xf32>
    %cst_48 = arith.constant dense<0.000000e+00> : vector<6xf32>
    %72 = vector.multi_reduction <add>, %71, %cst_48 [1] : vector<6x648xf32> to vector<6xf32>
    %73 = vector.shape_cast %72 : vector<6xf32> to vector<6x1xf32>
    %cst_49 = arith.constant 6.480000e+02 : f32
    %74 = vector.broadcast %cst_49 : f32 to vector<6x1xf32>
    %75 = arith.divf %73, %74 : vector<6x1xf32>
    %c0_50 = arith.constant 0 : index
    %c0_51 = arith.constant 0 : index
    %76 = vector.load %arg3[%c0_50, %c0_51] : memref<6x1xf32, #tpu.memory_space<vmem>>, vector<6x1xf32>
    %cst_52 = arith.constant 9.99999974E-6 : f32
    %77 = vector.broadcast %cst_52 : f32 to vector<6x1xf32>
    %78 = arith.addf %75, %77 : vector<6x1xf32>
    %79 = math.rsqrt %78 : vector<6x1xf32>
    %80 = arith.mulf %76, %79 : vector<6x1xf32>
    %81 = vector.broadcast %80 : vector<6x1xf32> to vector<6x648xf32>
    %82 = arith.mulf %70, %81 : vector<6x648xf32>
    %c0_53 = arith.constant 0 : index
    %c0_54 = arith.constant 0 : index
    %83 = vector.load %arg4[%c0_53, %c0_54] : memref<6x1xf32, #tpu.memory_space<vmem>>, vector<6x1xf32>
    %84 = vector.broadcast %83 : vector<6x1xf32> to vector<6x648xf32>
    %85 = arith.addf %82, %84 : vector<6x648xf32>
    %cst_55 = arith.constant 0.000000e+00 : f32
    %86 = vector.broadcast %cst_55 : f32 to vector<6x648xf32>
    %87 = arith.maximumf %85, %86 : vector<6x648xf32>
    %c0_56 = arith.constant 0 : index
    %c0_57 = arith.constant 0 : index
    %88 = vector.load %arg5[%c0_56, %c0_57] : memref<6x648xf32, #tpu.memory_space<vmem>>, vector<6x648xf32>
    tpu.vector_store %arg5[%c0_56, %c0_57], %87 {strides = array<i32>} : memref<6x648xf32, #tpu.memory_space<vmem>>, vector<6x648xf32>,
    return
  }
}

</mosaic_0001>

<bundles_post_ra>
// kernel: tpu_custom_call.1
= control target key start
LH: loop header
LB: loop body
LE: loop exit
PB: predicated region body
PF: predicated region fallthrough
CT: control target
= control target key end

     0   :  { %10 = vsyncpa [#allocation3], 0  ;;  %s612_s0 = inlined_call_operand.hbm [shape: f32[9,6,648], index: 0, kind: input, shape index: {}]   ;;  %s613_s1 = inlined_call_operand.vmem [shape: f32[9,6,1], index: 1, kind: input, shape index: {}]   ;;  %s614_s2 = inlined_call_operand.vmem [shape: f32[6,1], index: 2, kind: input, shape index: {}]   ;;  %s615_s3 = inlined_call_operand.vmem [shape: f32[6,1], index: 3, kind: input, shape index: {}]   ;;  %s616_s4 = inlined_call_operand.vmem [shape: f32[6,1], index: 4, kind: input, shape index: {}]   ;;  %s617_s5 = inlined_call_operand.hbm [shape: f32[6,648], index: 5, kind: output, shape index: {}]  }
   0x1   :  { %11 = vsyncpa [#allocation4], 0  ;;  %s16_s20 = sshll.u32 %s612_s0, 4  ;;  %s462_s21 = smov [#allocation2]   ;;  %s17_s20 = int_to_ptr.hbm [resolvable:$true] %s16_s20 }
   0x2   :  { %s18_s22 = sshll.u32 %s462_s21, 4  ;;  %s463_s23 = smov 768   ;;  %s19_s22 = int_to_ptr.vmem [resolvable:$true] %s18_s22 }
   0x3   :  { %s464_s24 = smov 48  }
   0x4   :  { %24 = dma.hbm_to_vmem [thread:$0]  %s17_s20, 6912, %s19_s22, [#allocation3], %s463_s23, %s463_s23, %s464_s24  }
   0x5   :  { %458 = dma.done.wait [#allocation3], 6912  }
   0x6   :  { %459 = vsyncadd [#allocation3], 4294960384  ;;  %v465_v0 = vmov 0   ;;  %v389_v1 = vld [vmem:[%s613_s1 + $0x8] sm:$0x3f]  ;;  %vm275_vm0 = vcmask 1045504  }
   0x7   :  { %404 = vset.pattern.permute.xlu1 %v465_v0  ;;  %403 = vset.pattern.permute.xlu0 %v465_v0  ;;  %v44_v2 = vld [vmem:[%s613_s1] sm:$0x3f]  ;;  %v391_v3 = vld [vmem:[%s613_s1 + $0x18] sm:$0x3f]  ;;  %v390_v4 = vld [vmem:[%s613_s1 + $0x10] sm:$0x3f] }
   0x8   :  { %405 = vset.pattern.permute.xlu2 %v465_v0  ;;  %78 = vperm.xlu1 %404, %v389_v1   ;;  %v37_v5 = vld [vmem:[%s614_s2] sm:$0x3f]  ;;  %v394_v7 = vld [vmem:[%s613_s1 + $0x30] sm:$0x3f]  ;;  %v393_v8 = vld [vmem:[%s613_s1 + $0x28] sm:$0x3f] }
   0x9   :  { %47 = vperm.xlu0 %403, %v44_v2   ;;  %130 = vperm.xlu2 %405, %v391_v3   ;;  %v392_v6 = vld [vmem:[%s613_s1 + $0x20] sm:$0x3f]  ;;  %v395_v9 = vld [vmem:[%s613_s1 + $0x38] sm:$0x3f]  ;;  %v120_v13 = vld [vmem:[#allocation2 + $0x90] sm:$0x3f] }
   0xa   :  { %v396_v10 = vld [vmem:[%s613_s1 + $0x40] sm:$0x3f]  ;;  %v121_v14 = vld [vmem:[#allocation2 + $0x98] sm:$0x3f]  ;;  %v123_v16 = vld [vmem:[#allocation2 + $0xa8] sm:$0x3f] }
   0xb   :  { %v122_v15 = vld [vmem:[#allocation2 + $0xa0] sm:$0x3f]  ;;  %v124_v17 = vld [vmem:[#allocation2 + $0xb0] sm:$0x3f]  ;;  %v125_v18 = vld [vmem:[#allocation2 + $0xb8] sm:$0x3f] }
   0xc   :  { %v146_v19 = vld [vmem:[#allocation2 + $0xc0] sm:$0x3f]  ;;  %v147_v22 = vld [vmem:[#allocation2 + $0xc8] sm:$0x3f]  ;;  %v148_v23 = vld [vmem:[#allocation2 + $0xd0] sm:$0x3f] }
   0xd   :  { %v149_v24 = vld [vmem:[#allocation2 + $0xd8] sm:$0x3f]  ;;  %v150_v25 = vld [vmem:[#allocation2 + $0xe0] sm:$0x3f]  ;;  %v151_v26 = vld [vmem:[#allocation2 + $0xe8] sm:$0x3f] }
   0xe   :  { %v68_v27 = vld [vmem:[#allocation2 + $0x30] sm:$0x3f]  ;;  %v69_v29 = vld [vmem:[#allocation2 + $0x38] sm:$0x3f]  ;;  %v70_v30 = vld [vmem:[#allocation2 + $0x40] sm:$0x3f] }
   0xf   :  { %v224_v31 = vld [vmem:[#allocation2 + $0x150] sm:$0x3f]  ;;  %v71_v37 = vld [vmem:[#allocation2 + $0x48] sm:$0x3f]  ;;  %v73_v39 = vld [vmem:[#allocation2 + $0x58] sm:$0x3f] }
  0x10   :  { %104 = vperm.xlu1 %404, %v390_v4   ;;  %v72_v38 = vld [vmem:[#allocation2 + $0x50] sm:$0x3f]  ;;  %v38_v44 = vld [vmem:[#allocation2] sm:$0x3f]  ;;  %v39_v45 = vld [vmem:[#allocation2 + $0x8] sm:$0x3f] }
  0x11   :  { %58 = vperm.xlu0 %403, %v37_v5   ;;  %156 = vperm.xlu2 %405, %v392_v6   ;;  %v40_v46 = vld [vmem:[#allocation2 + $0x10] sm:$0x3f]  ;;  %v41_v50 = vld [vmem:[#allocation2 + $0x18] sm:$0x3f]  ;;  %v42_v51 = vld [vmem:[#allocation2 + $0x20] sm:$0x3f] }
  0x12   :  { %v43_v52 = vld [vmem:[#allocation2 + $0x28] sm:$0x3f]  ;;  %v94_v58 = vld [vmem:[#allocation2 + $0x60] sm:$0x3f]  ;;  %v96_v6 = vld [vmem:[#allocation2 + $0x70] sm:$0x3f] }
  0x13   :  { %v95_v59 = vld [vmem:[#allocation2 + $0x68] sm:$0x3f]  ;;  %vm285_vm1 = vcmask 62464   ;;  %s379_s23 = sshll.u32 %s617_s5, 4  ;;  %s380_s23 = int_to_ptr.hbm [resolvable:$true] %s379_s23 }
  0x18   :  { %208 = vperm.xlu1 %404, %v394_v7   ;;  %v97_v7 = vld [vmem:[#allocation2 + $0x78] sm:$0x3f] }
  0x19   :  { %182 = vperm.xlu0 %403, %v393_v8   ;;  %234 = vperm.xlu2 %405, %v395_v9  }
  0x21   :  { %260 = vperm.xlu0 %403, %v396_v10  }
  0x63   :  { %v131_v11 = vpop.permute.xlu2 %130 }
  0x64   :  { %v531_v28 = vmul.f32 %v131_v11, %v120_v13  ;;  %v535_v33 = vmul.f32 %v131_v11, %v121_v14  ;;  %v537_v34 = vmul.f32 %v131_v11, %v122_v15  ;;  %v539_v35 = vmul.f32 %v131_v11, %v123_v16  ;;  %v226_v13 = vld [vmem:[#allocation2 + $0x160] sm:$0x3f] }
  0x65   :  { %v541_v36 = vmul.f32 %v131_v11, %v124_v17  ;;  %v543_v40 = vmul.f32 %v131_v11, %v125_v18  ;;  %v98_v18 = vld [vmem:[#allocation2 + $0x80] sm:$0x3f] }
  0x6b   :  { %v157_v12 = vpop.permute.xlu2 %156 }
  0x6c   :  { %v545_v41 = vmul.f32 %v157_v12, %v146_v19  ;;  %v547_v42 = vmul.f32 %v157_v12, %v147_v22  ;;  %v549_v43 = vmul.f32 %v157_v12, %v148_v23  ;;  %v551_v47 = vmul.f32 %v157_v12, %v149_v24  ;;  %v99_v19 = vld [vmem:[#allocation2 + $0x88] sm:$0x3f] }
  0x6d   :  { %v553_v48 = vmul.f32 %v157_v12, %v150_v25  ;;  %v555_v49 = vmul.f32 %v157_v12, %v151_v26  ;;  %v225_v12 = vld [vmem:[#allocation2 + $0x158] sm:$0x3f]  ;;  %v227_v25 = vld [vmem:[#allocation2 + $0x168] sm:$0x3f] }
  0x73   :  { %v533_v32 = vpop.permute.xlu2 %234 }
  0x74   :  { %v558_v53 = vmul.f32 %v533_v32, %v224_v31  ;;  %v561_v31 = vmul.f32 %v533_v32, %v225_v12 }
  0x7a   :  { %v79_v20 = vpop.permute.xlu1 %78 }
  0x7b   :  { %v48_v21 = vpop.permute.xlu0 %47  ;;  %v81_v54 = vmul.f32 %v79_v20, %v68_v27  ;;  %v82_v55 = vmul.f32 %v79_v20, %v69_v29  ;;  %v83_v56 = vmul.f32 %v79_v20, %v70_v30  ;;  %v84_v57 = vmul.f32 %v79_v20, %v71_v37  ;;  %v228_v30 = vld [vmem:[#allocation2 + $0x170] sm:$0x3f] }
  0x7c   :  { %v85_v60 = vmul.f32 %v79_v20, %v72_v38  ;;  %v86_v61 = vmul.f32 %v79_v20, %v73_v39  ;;  %v50_v62 = vmul.f32 %v48_v21, %v38_v44  ;;  %v51_v63 = vmul.f32 %v48_v21, %v39_v45  ;;  %v198_v44 = vld [vmem:[#allocation2 + $0x120] sm:$0x3f]  ;;  %v199_v45 = vld [vmem:[#allocation2 + $0x128] sm:$0x3f] }
  0x7d   :  { %v52_v2 = vmul.f32 %v48_v21, %v40_v46  ;;  %v53_v3 = vmul.f32 %v48_v21, %v41_v50  ;;  %v54_v4 = vmul.f32 %v48_v21, %v42_v51  ;;  %v55_v5 = vmul.f32 %v48_v21, %v43_v52 }
  0x7e   :  { %v564_v37 = vmul.f32 %v533_v32, %v226_v13 }
  0x82   :  { %v105_v0 = vpop.permute.xlu1 %104 }
  0x83   :  { %v59_v1 = vpop.permute.xlu0 %58  ;;  %v107_v8 = vmul.f32 %v105_v0, %v94_v58  ;;  %v108_v9 = vmul.f32 %v105_v0, %v95_v59  ;;  %v109_v20 = vmul.f32 %v105_v0, %v96_v6  ;;  %v110_v22 = vmul.f32 %v105_v0, %v97_v7  ;;  %v172_v59 = vld [vmem:[#allocation2 + $0xf0] sm:$0x3f] }
  0x84   :  { %v61_v10 = vadd.f32 %v59_v1, %v50_v62  ;;  %v62_v11 = vadd.f32 %v59_v1, %v51_v63  ;;  %v63_v14 = vadd.f32 %v59_v1, %v52_v2  ;;  %v64_v15 = vadd.f32 %v59_v1, %v53_v3  ;;  %v201_v2 = vld [vmem:[#allocation2 + $0x138] sm:$0x3f] }
  0x85   :  { %v65_v16 = vadd.f32 %v59_v1, %v54_v4  ;;  %v66_v17 = vadd.f32 %v59_v1, %v55_v5  ;;  %v111_v46 = vmul.f32 %v105_v0, %v98_v18  ;;  %v112_v50 = vmul.f32 %v105_v0, %v99_v19  ;;  %v175_v5 = vld [vmem:[#allocation2 + $0x108] sm:$0x3f]  ;;  %v202_v18 = vld [vmem:[#allocation2 + $0x140] sm:$0x3f] }
  0x86   :  { %v87_v23 = vadd.f32 %v81_v54, %v61_v10  ;;  %v88_v24 = vadd.f32 %v82_v55, %v62_v11  ;;  %v89_v21 = vadd.f32 %v83_v56, %v63_v14  ;;  %v90_v26 = vadd.f32 %v84_v57, %v64_v15  ;;  %v200_v54 = vld [vmem:[#allocation2 + $0x130] sm:$0x3f]  ;;  %v177_v10 = vld [vmem:[#allocation2 + $0x118] sm:$0x3f] }
  0x87   :  { %v91_v27 = vadd.f32 %v85_v60, %v65_v16  ;;  %v92_v29 = vadd.f32 %v86_v61, %v66_v17  ;;  %v567_v55 = vmul.f32 %v533_v32, %v227_v25  ;;  %v173_v60 = vld [vmem:[#allocation2 + $0xf8] sm:$0x3f]  ;;  %v174_v61 = vld [vmem:[#allocation2 + $0x100] sm:$0x3f]  ;;  %v572_v63 = vmul.f32 %v533_v32, %v228_v30  ;;  %v252_v25 = vld [vmem:[#allocation2 + $0x190] sm:$0x3f] }
  0x88   :  { %v113_v38 = vadd.f32 %v107_v8, %v87_v23  ;;  %v114_v39 = vadd.f32 %v108_v9, %v88_v24  ;;  %v115_v51 = vadd.f32 %v109_v20, %v89_v21  ;;  %v116_v52 = vadd.f32 %v110_v22, %v90_v26  ;;  %v176_v8 = vld [vmem:[#allocation2 + $0x110] sm:$0x3f]  ;;  %v251_v24 = vld [vmem:[#allocation2 + $0x188] sm:$0x3f] }
  0x89   :  { %v117_v1 = vadd.f32 %v111_v46, %v91_v27  ;;  %v118_v0 = vadd.f32 %v112_v50, %v92_v29 }
  0x8a   :  { %v209_v56 = vpop.permute.xlu1 %208  ;;  %v139_v57 = vadd.f32 %v531_v28, %v113_v38  ;;  %v140_v58 = vadd.f32 %v535_v33, %v114_v39  ;;  %v141_v7 = vadd.f32 %v537_v34, %v115_v51  ;;  %v142_v28 = vadd.f32 %v539_v35, %v116_v52  ;;  %v254_v52 = vld [vmem:[#allocation2 + $0x1a0] sm:$0x3f] }
  0x8b   :  { %v183_v62 = vpop.permute.xlu0 %182  ;;  %v211_v3 = vmul.f32 %v209_v56, %v198_v44  ;;  %v212_v4 = vmul.f32 %v209_v56, %v199_v45  ;;  %v213_v6 = vmul.f32 %v209_v56, %v200_v54  ;;  %v214_v14 = vmul.f32 %v209_v56, %v201_v2  ;;  %v253_v44 = vld [vmem:[#allocation2 + $0x198] sm:$0x3f] }
  0x8c   :  { %v165_v33 = vadd.f32 %v545_v41, %v139_v57  ;;  %v166_v9 = vadd.f32 %v547_v42, %v140_v58  ;;  %v185_v11 = vmul.f32 %v183_v62, %v172_v59  ;;  %v186_v12 = vmul.f32 %v183_v62, %v173_v60  ;;  %v250_v42 = vld [vmem:[#allocation2 + $0x180] sm:$0x3f]  ;;  %v229_v57 = vld [vmem:[#allocation2 + $0x178] sm:$0x3f]  ;;  %v255_v59 = vld [vmem:[#allocation2 + $0x1a8] sm:$0x3f] }
  0x8d   :  { %v187_v13 = vmul.f32 %v183_v62, %v174_v61  ;;  %v167_v15 = vadd.f32 %v549_v43, %v141_v7  ;;  %v168_v16 = vadd.f32 %v551_v47, %v142_v28  ;;  %v188_v17 = vmul.f32 %v183_v62, %v175_v5  ;;  %v203_v47 = vld [vmem:[#allocation2 + $0x148] sm:$0x3f] }
  0x8e   :  { %v189_v19 = vmul.f32 %v183_v62, %v176_v8  ;;  %v191_v34 = vadd.f32 %v185_v11, %v165_v33  ;;  %v192_v20 = vadd.f32 %v186_v12, %v166_v9  ;;  %v143_v35 = vadd.f32 %v541_v36, %v117_v1 }
  0x8f   :  { %v190_v41 = vmul.f32 %v183_v62, %v177_v10  ;;  %v193_v22 = vadd.f32 %v187_v13, %v167_v15  ;;  %v194_v23 = vadd.f32 %v188_v17, %v168_v16  ;;  %v144_v21 = vadd.f32 %v543_v40, %v118_v0 }
  0x90   :  { %v217_v26 = vadd.f32 %v211_v3, %v191_v34  ;;  %v218_v27 = vadd.f32 %v212_v4, %v192_v20  ;;  %v169_v43 = vadd.f32 %v553_v48, %v143_v35  ;;  %v215_v29 = vmul.f32 %v209_v56, %v202_v18 }
  0x91   :  { %v170_v38 = vadd.f32 %v555_v49, %v144_v21  ;;  %v219_v39 = vadd.f32 %v213_v6, %v193_v22  ;;  %v220_v36 = vadd.f32 %v214_v14, %v194_v23  ;;  %v216_v40 = vmul.f32 %v209_v56, %v203_v47 }
  0x92   :  { %v195_v51 = vadd.f32 %v189_v19, %v169_v43  ;;  %v243_v58 = vadd.f32 %v558_v53, %v217_v26  ;;  %v244_v48 = vadd.f32 %v561_v31, %v218_v27  ;;  %v242_v4 = vmul.f32 %v533_v32, %v229_v57 }
  0x93   :  { %v261_v30 = vpop.permute.xlu0 %260  ;;  %v196_v54 = vadd.f32 %v190_v41, %v170_v38  ;;  %v245_v61 = vadd.f32 %v564_v37, %v219_v39  ;;  %v246_v49 = vadd.f32 %v567_v55, %v220_v36  ;;  %v466_v14 = vmov 648.0  }
  0x94   :  { %v263_v45 = vmul.f32 %v261_v30, %v250_v42  ;;  %v264_v46 = vmul.f32 %v261_v30, %v251_v24  ;;  %v265_v50 = vmul.f32 %v261_v30, %v252_v25  ;;  %v221_v60 = vadd.f32 %v215_v29, %v195_v51 }
  0x95   :  { %v266_v62 = vmul.f32 %v261_v30, %v253_v44  ;;  %v222_v1 = vadd.f32 %v216_v40, %v196_v54  ;;  %v267_v0 = vmul.f32 %v261_v30, %v254_v52  ;;  %v268_v5 = vmul.f32 %v261_v30, %v255_v59 }
  0x96   :  { %v269_v2 = vadd.f32 %v263_v45, %v243_v58  ;;  %v270_v3 = vadd.f32 %v264_v46, %v244_v48  ;;  %v271_v56 = vadd.f32 %v265_v50, %v245_v61  ;;  %v247_v6 = vadd.f32 %v572_v63, %v221_v60 }
  0x97   :  { %v272_v53 = vadd.f32 %v266_v62, %v246_v49  ;;  %v248_v37 = vadd.f32 %v242_v4, %v222_v1  ;;  %406 = vrcp.f32 %v466_v14  ;;  %v324_v62 = vld [vmem:[%s615_s3] sm:$0x3f]  ;;  %s467_s3 = smov [#allocation5]  }
  0x98   :  { %v276_v31 = vsel %vm275_vm0, %v269_v2, 0.0  ;;  %v277_v7 = vsel %vm275_vm0, %v270_v3, 0.0  ;;  %v273_v33 = vadd.f32 %v267_v0, %v247_v6  ;;  %v279_v55 = vsel %vm275_vm0, %v271_v56, 0.0 }
  0x99   :  { %v278_v28 = vadd.f32 %v277_v7, %v276_v31  ;;  %v274_v9 = vadd.f32 %v268_v5, %v248_v37  ;;  %v281_v10 = vsel %vm275_vm0, %v272_v53, 0.0 }
  0x9a   :  { %v283_v32 = vsel %vm275_vm0, %v273_v33, 0.0 }
  0x9b   :  { %v280_v8 = vadd.f32 %v279_v55, %v278_v28  ;;  %v286_v63 = vsel %vm285_vm1, %v274_v9, 0.0 }
  0x9d   :  { %v282_v11 = vadd.f32 %v281_v10, %v280_v8  ;;  %v407_v15 = vpop.eup %406 }
  0x9e   :  { %v291_v16 = vmul.f32 648.0, %v407_v15  ;;  %vm295_vm2 = vweird.f32 %v407_v15 }
  0x9f   :  { %v284_v12 = vadd.f32 %v283_v32, %v282_v11 }
  0xa0   :  { %v292_v17 = vsub.f32 1.0, %v291_v16 }
  0xa1   :  { %v287_v13 = vadd.f32 %v286_v63, %v284_v12 }
  0xa2   :  { %v293_v18 = vmul.f32 %v407_v15, %v292_v17 }
  0xa3   :  { %288 = vadd.xlane.f32.xlu1 %v287_v13 }
  0xa4   :  { %v294_v19 = vadd.f32 %v407_v15, %v293_v18 }
  0xa6   :  { %v296_v34 = vsel %vm295_vm2, %v407_v15, %v294_v19 }
 0x116   :  { %v289_v20 = vpop.xlane.xlu1 %288 }
 0x117   :  { %v297_v35 = vmul.f32 %v296_v34, %v289_v20 }
 0x119   :  { %v298_v41 = vsub.f32 %v269_v2, %v297_v35  ;;  %v299_v22 = vsub.f32 %v270_v3, %v297_v35  ;;  %v300_v23 = vsub.f32 %v271_v56, %v297_v35  ;;  %v301_v42 = vsub.f32 %v272_v53, %v297_v35  ;;  %v348_v3 = vld [vmem:[%s616_s4] sm:$0x3f]  ;;  %s377_s4 = sshll.u32 %s467_s3, 4  ;;  %s378_s4 = int_to_ptr.vmem [resolvable:$true] %s377_s4 }
 0x11a   :  { %v302_v24 = vsub.f32 %v273_v33, %v297_v35  ;;  %v303_v27 = vsub.f32 %v274_v9, %v297_v35 }
 0x11b   :  { %v304_v25 = vmul.f32 %v298_v41, %v298_v41  ;;  %v305_v21 = vmul.f32 %v299_v22, %v299_v22  ;;  %v306_v26 = vmul.f32 %v300_v23, %v300_v23  ;;  %v307_v43 = vmul.f32 %v301_v42, %v301_v42 }
 0x11c   :  { %v308_v38 = vmul.f32 %v302_v24, %v302_v24  ;;  %v309_v44 = vmul.f32 %v303_v27, %v303_v27 }
 0x11d   :  { %v310_v47 = vsel %vm275_vm0, %v304_v25, 0.0  ;;  %v311_v29 = vsel %vm275_vm0, %v305_v21, 0.0  ;;  %v313_v39 = vsel %vm275_vm0, %v306_v26, 0.0  ;;  %v315_v45 = vsel %vm275_vm0, %v307_v43, 0.0 }
 0x11e   :  { %v312_v30 = vadd.f32 %v311_v29, %v310_v47  ;;  %v317_v50 = vsel %vm275_vm0, %v308_v38, 0.0  ;;  %v319_v52 = vsel %vm285_vm1, %v309_v44, 0.0 }
 0x120   :  { %v314_v36 = vadd.f32 %v313_v39, %v312_v30 }
 0x122   :  { %v316_v46 = vadd.f32 %v315_v45, %v314_v36 }
 0x124   :  { %v318_v51 = vadd.f32 %v317_v50, %v316_v46 }
 0x126   :  { %v320_v54 = vadd.f32 %v319_v52, %v318_v51 }
 0x128   :  { %321 = vadd.xlane.f32.xlu2 %v320_v54 }
 0x19b   :  { %v322_v40 = vpop.xlane.xlu2 %321 }
 0x19c   :  { %v323_v57 = vmul.f32 %v322_v40, %v296_v34 }
 0x19e   :  { %v325_v58 = vadd.f32 1e-05, %v323_v57 }
 0x1a0   :  { %408 = vrsqrt.f32 %v325_v58  ;;  %vm332_vm4 = vweird.f32 %v325_v58 }
 0x1a6   :  { %v409_v48 = vpop.eup %408 }
 0x1a7   :  { %v327_v59 = vmul.f32 %v409_v48, %v325_v58  ;;  %vm333_vm3 = vweird.f32 %v409_v48 }
 0x1a8   :  { %vm334_vm5 = vmor %vm332_vm4, %vm333_vm3 }
 0x1a9   :  { %v328_v60 = vmul.f32 %v409_v48, %v327_v59 }
 0x1ab   :  { %v329_v61 = vmul.f32 0.5, %v328_v60 }
 0x1ad   :  { %v330_v49 = vsub.f32 1.5, %v329_v61 }
 0x1af   :  { %v331_v1 = vmul.f32 %v409_v48, %v330_v49 }
 0x1b1   :  { %v335_v0 = vsel %vm334_vm5, %v409_v48, %v331_v1 }
 0x1b2   :  { %v336_v2 = vmul.f32 %v335_v0, %v324_v62 }
 0x1b4   :  { %339 = vperm.xlu0 %403, %v336_v2  }
 0x1bc   :  { %351 = vperm.xlu0 %403, %v348_v3  }
 0x226   :  { %v340_v4 = vpop.permute.xlu0 %339 }
 0x227   :  { %v342_v5 = vmul.f32 %v340_v4, %v298_v41  ;;  %v343_v56 = vmul.f32 %v340_v4, %v299_v22  ;;  %v344_v6 = vmul.f32 %v340_v4, %v300_v23  ;;  %v345_v53 = vmul.f32 %v340_v4, %v301_v42 }
 0x228   :  { %v346_v31 = vmul.f32 %v340_v4, %v302_v24  ;;  %v347_v7 = vmul.f32 %v340_v4, %v303_v27 }
 0x22e   :  { %v352_v28 = vpop.permute.xlu0 %351 }
 0x22f   :  { %v354_v37 = vadd.f32 %v352_v28, %v342_v5  ;;  %v355_v33 = vadd.f32 %v352_v28, %v343_v56  ;;  %v356_v55 = vadd.f32 %v352_v28, %v344_v6  ;;  %v357_v8 = vadd.f32 %v352_v28, %v345_v53 }
 0x230   :  { %v358_v9 = vadd.f32 %v352_v28, %v346_v31  ;;  %v359_v10 = vadd.f32 %v352_v28, %v347_v7 }
 0x231   :  { %v360_v11 = vmax.f32 %v354_v37, 0.0  ;;  %v361_v32 = vmax.f32 %v355_v33, 0.0  ;;  %v362_v12 = vmax.f32 %v356_v55, 0.0  ;;  %v363_v63 = vmax.f32 %v357_v8, 0.0 }
 0x232   :  { %v364_v13 = vmax.f32 %v358_v9, 0.0  ;;  %v365_v14 = vmax.f32 %v359_v10, 0.0 }
 0x233   :  { %366 = vst [vmem:[#allocation5] sm:$0x3f] %v360_v11 }
 0x234   :  { %367 = vst [vmem:[#allocation5 + $0x8] sm:$0x3f] %v361_v32 }
 0x235   :  { %368 = vst [vmem:[#allocation5 + $0x10] sm:$0x3f] %v362_v12 }
 0x236   :  { %369 = vst [vmem:[#allocation5 + $0x18] sm:$0x3f] %v363_v63 }
 0x237   :  { %370 = vst [vmem:[#allocation5 + $0x20] sm:$0x3f] %v364_v13 }
 0x238   :  { %371 = vst.msk [vmem:[#allocation5 + $0x28] sm:$0x3f] %vm285_vm1, %v365_v14 }
 0x239   :  { %382 = dma.vmem_to_hbm [thread:$0]  %s378_s4, 768, %s380_s23, [#allocation4]  }
 0x23a   :  { %460 = dma.done.wait [#allocation4], 768  }
 0x23b   :  { %461 = vsyncadd [#allocation4], 4294966528 }
 0x23c   :  { %387 = vsyncpa [#allocation3], 1 }
 0x23d   :  { %388 = vsyncpa [#allocation4], 1 }

</bundles_post_ra>
